<compile_context>
chip_gen: v7x
topology: tpu7x:2x2x1
jax: 0.10.0
libtpu: 0.0.40
codegen_flags: <defaults>
</compile_context>

<pallas_src>
import functools

import jax
import jax.numpy as jnp
from jax.experimental import pallas as pl
from jax.experimental.pallas import tpu as pltpu


def _cassle_kernel(p_ref, z_ref, loss_ref, m_ref, l_ref, d_ref, *,
                   inv_temperature, eps):
    i = pl.program_id(0)            # row tile   (parallel)
    j = pl.program_id(1)            # column tile (arbitrary / reduction)
    nj = pl.num_programs(1)

    @pl.when(j == 0)
    def _init():
        m_ref[...] = jnp.full(m_ref.shape, -jnp.inf, dtype=m_ref.dtype)
        l_ref[...] = jnp.zeros(l_ref.shape, dtype=l_ref.dtype)
        d_ref[...] = jnp.zeros(d_ref.shape, dtype=d_ref.dtype)

    p = p_ref[...].astype(jnp.float32)      # (T, F) rows of this row tile
    z = z_ref[...].astype(jnp.float32)      # (T, F) rows of this column tile

    # F.normalize(x, dim=-1) == x * rsqrt(max(sum(x*x), eps^2)); fold 1/T into
    # the p scale so the (T,T) logits never see a divide / extra multiply.
    p_scale = jax.lax.rsqrt(
        jnp.maximum(jnp.sum(p * p, axis=-1, keepdims=True), eps * eps)
    ) * inv_temperature
    z_scale = jax.lax.rsqrt(
        jnp.maximum(jnp.sum(z * z, axis=-1, keepdims=True), eps * eps)
    )
    p = p * p_scale
    z = z * z_scale
    # NOTE: for bf16-heavy production, p/z could be cast to bf16 here (keeping
    # preferred_element_type=f32) for MXU throughput; kept f32 for 1e-5 parity.

    # logits tile (T, T): contract feature dims directly (no z.T in VMEM).
    s = jax.lax.dot_general(p, z, (((1,), (1,)), ((), ())),
                            preferred_element_type=jnp.float32)

    # Online (flash-style) running row-max / sum-exp update.
    m_prev = m_ref[...]
    m_new = jnp.maximum(m_prev, jnp.max(s, axis=1, keepdims=True))
    l_ref[...] = l_ref[...] * jnp.exp(m_prev - m_new) + jnp.sum(
        jnp.exp(s - m_new), axis=1, keepdims=True)
    m_ref[...] = m_new

    # The positive (diagonal) logit lives in the tile where j == i; compute it
    # directly as an elementwise row dot (no NxN pos_mask).
    @pl.when(j == i)
    def _diag():
        d_ref[...] = jnp.sum(p * z, axis=-1, keepdims=True)

    # Per-row loss, written once after the last column tile.
    @pl.when(j == nj - 1)
    def _finalize():
        loss_ref[...] = -(d_ref[...] - m_ref[...] - jnp.log(l_ref[...]))


def _pick_tile(n, f):
    """Largest square row/col tile that divides n and keeps the double-buffered
    (t,f) p/z tiles plus the (t,t) logits block well under v7x's 64 MiB VMEM."""
    budget = 40 * 1024 * 1024
    for t in (512, 256, 128, 64, 32, 16, 8):
        if n % t != 0:
            continue
        if 4 * (4 * t * f + t * t) <= budget or t == 8:
            return t
    return n   # tiny / odd n: a single full-size tile (block == full array dim)


def cassle_loss(p1, p2, z1, z2, temperature=0.07, tile=None):
    # TODO(synk): the concatenate writes one extra (2b, F) HBM copy of p and z;
    # avoiding it needs per-view index_map plumbing over 4 separate inputs.
    p = jnp.concatenate([p1, p2], axis=0)   # (N, F), N = 2b
    z = jnp.concatenate([z1, z2], axis=0)   # (N, F)
    n, f = p.shape
    t = tile if (tile is not None and n % tile == 0) else _pick_tile(n, f)

    kernel = functools.partial(
        _cassle_kernel, inv_temperature=1.0 / temperature, eps=1e-12)

    per_row = pl.pallas_call(
        kernel,
        out_shape=jax.ShapeDtypeStruct((n, 1), jnp.float32),
        grid_spec=pltpu.PrefetchScalarGridSpec(
            num_scalar_prefetch=0,
            grid=(n // t, n // t),
            in_specs=[
                pl.BlockSpec((t, f), lambda i, j: (i, 0)),   # p row tile
                pl.BlockSpec((t, f), lambda i, j: (j, 0)),   # z column tile
            ],
            out_specs=pl.BlockSpec((t, 1), lambda i, j: (i, 0)),
            scratch_shapes=[pltpu.VMEM((t, 1), jnp.float32)] * 3,  # m, l, diag
        ),
        compiler_params=pltpu.CompilerParams(
            dimension_semantics=("parallel", "arbitrary"),
            vmem_limit_bytes=48 * 1024 * 1024,
        ),
    )(p, z)

    # Tiny (N,) mean left to XLA so the row grid axis stays megacore-parallel.
    return jnp.mean(per_row)


def _cassle_loss_ref(p1, p2, z1, z2, temperature=0.07):
    """Pure-JAX reference mirroring the PyTorch module."""
    p = jnp.concatenate([p1, p2], axis=0).astype(jnp.float32)
    z = jnp.concatenate([z1, z2], axis=0).astype(jnp.float32)
    p = p / jnp.maximum(jnp.linalg.norm(p, axis=-1, keepdims=True), 1e-12)
    z = z / jnp.maximum(jnp.linalg.norm(z, axis=-1, keepdims=True), 1e-12)
    logits = (p @ z.T) / temperature
    logits = logits - jnp.max(logits, axis=1, keepdims=True)
    log_prob = logits - jnp.log(jnp.sum(jnp.exp(logits), axis=1, keepdims=True))
    return -jnp.mean(jnp.diag(log_prob))


if __name__ == "__main__":
    key = jax.random.PRNGKey(0)
    b, f = 8, 32   # batch and projection/feature dim (small synthetic shapes)
    k1, k2, k3, k4 = jax.random.split(key, 4)
    p1 = jax.random.normal(k1, (b, f), dtype=jnp.float32)
    p2 = jax.random.normal(k2, (b, f), dtype=jnp.float32)
    z1 = jax.random.normal(k3, (b, f), dtype=jnp.float32)
    z2 = jax.random.normal(k4, (b, f), dtype=jnp.float32)

    ref = _cassle_loss_ref(p1, p2, z1, z2, temperature=0.07)

    # Single-tile path (grid (1,1)).
    loss = cassle_loss(p1, p2, z1, z2, temperature=0.07)
    jax.block_until_ready(loss)
    assert jnp.allclose(loss, ref, rtol=1e-5, atol=1e-5), (loss, ref)

    # Multi-tile path: forces a 2x2 grid so the online-softmax accumulation,
    # diagonal selection (j == i) and last-column finalize are exercised.
    loss_tiled = cassle_loss(p1, p2, z1, z2, temperature=0.07, tile=8)
    jax.block_until_ready(loss_tiled)
    assert jnp.allclose(loss_tiled, ref, rtol=1e-5, atol=1e-5), (loss_tiled, ref)

    print("KERNEL_OK")
</pallas_src>

<mosaic_0001>
module attributes {stable_mosaic.version = 11 : i64} {
  func.func @_cassle_kernel(%arg0: i32, %arg1: i32, %arg2: memref<16x32xf32, #tpu.memory_space<vmem>>, %arg3: memref<16x32xf32, #tpu.memory_space<vmem>>, %arg4: memref<16x1xf32, #tpu.memory_space<vmem>>, %arg5: memref<16x1xf32, #tpu.memory_space<vmem>>, %arg6: memref<16x1xf32, #tpu.memory_space<vmem>>, %arg7: memref<16x1xf32, #tpu.memory_space<vmem>>) attributes {dimension_semantics = [#tpu.dimension_semantics<parallel>, #tpu.dimension_semantics<arbitrary>], iteration_bounds = array<i64: 1, 1>, scalar_prefetch = 0 : i64, scratch_operands = 3 : i64, tpu.core_type = #tpu.core_type<tc>, window_params = [{transform_indices = @transform_0, window_bounds = array<i64: 16, 32>}, {transform_indices = @transform_1, window_bounds = array<i64: 16, 32>}, {transform_indices = @transform_2, window_bounds = array<i64: 16, 1>}]} {
    %c0_i32 = arith.constant 0 : i32
    %0 = arith.cmpi eq, %arg1, %c0_i32 : i32
    %1 = arith.extui %0 : i1 to i32
    %c0_i32_0 = arith.constant 0 : i32
    %2 = arith.cmpi ne, %1, %c0_i32_0 : i32
    scf.if %2 {
      %cst_22 = arith.constant 0xFF800000 : f32
      %46 = vector.broadcast %cst_22 : f32 to vector<16x1xf32>
      %c0_23 = arith.constant 0 : index
      %c0_24 = arith.constant 0 : index
      %47 = vector.load %arg5[%c0_23, %c0_24] : memref<16x1xf32, #tpu.memory_space<vmem>>, vector<16x1xf32>
      tpu.vector_store %arg5[%c0_23, %c0_24], %46 {strides = array<i32>} : memref<16x1xf32, #tpu.memory_space<vmem>>, vector<16x1xf32>,
      %cst_25 = arith.constant 0.000000e+00 : f32
      %48 = vector.broadcast %cst_25 : f32 to vector<16x1xf32>
      %c0_26 = arith.constant 0 : index
      %c0_27 = arith.constant 0 : index
      %49 = vector.load %arg6[%c0_26, %c0_27] : memref<16x1xf32, #tpu.memory_space<vmem>>, vector<16x1xf32>
      tpu.vector_store %arg6[%c0_26, %c0_27], %48 {strides = array<i32>} : memref<16x1xf32, #tpu.memory_space<vmem>>, vector<16x1xf32>,
      %cst_28 = arith.constant 0.000000e+00 : f32
      %50 = vector.broadcast %cst_28 : f32 to vector<16x1xf32>
      %c0_29 = arith.constant 0 : index
      %c0_30 = arith.constant 0 : index
      %51 = vector.load %arg7[%c0_29, %c0_30] : memref<16x1xf32, #tpu.memory_space<vmem>>, vector<16x1xf32>
      tpu.vector_store %arg7[%c0_29, %c0_30], %50 {strides = array<i32>} : memref<16x1xf32, #tpu.memory_space<vmem>>, vector<16x1xf32>,
    } else {
    }
    %c0 = arith.constant 0 : index
    %c0_1 = arith.constant 0 : index
    %3 = vector.load %arg2[%c0, %c0_1] : memref<16x32xf32, #tpu.memory_space<vmem>>, vector<16x32xf32>
    %c0_2 = arith.constant 0 : index
    %c0_3 = arith.constant 0 : index
    %4 = vector.load %arg3[%c0_2, %c0_3] : memref<16x32xf32, #tpu.memory_space<vmem>>, vector<16x32xf32>
    %5 = arith.mulf %3, %3 : vector<16x32xf32>
    %cst = arith.constant dense<0.000000e+00> : vector<16xf32>
    %6 = vector.multi_reduction <add>, %5, %cst [1] : vector<16x32xf32> to vector<16xf32>
    %7 = vector.shape_cast %6 : vector<16xf32> to vector<16x1xf32>
    %cst_4 = arith.constant 1.000000e-24 : f32
    %8 = vector.broadcast %cst_4 : f32 to vector<16x1xf32>
    %9 = arith.maximumf %7, %8 : vector<16x1xf32>
    %10 = math.rsqrt %9 : vector<16x1xf32>
    %cst_5 = arith.constant 14.2857141 : f32
    %11 = vector.broadcast %cst_5 : f32 to vector<16x1xf32>
    %12 = arith.mulf %10, %11 : vector<16x1xf32>
    %13 = arith.mulf %4, %4 : vector<16x32xf32>
    %cst_6 = arith.constant dense<0.000000e+00> : vector<16xf32>
    %14 = vector.multi_reduction <add>, %13, %cst_6 [1] : vector<16x32xf32> to vector<16xf32>
    %15 = vector.shape_cast %14 : vector<16xf32> to vector<16x1xf32>
    %cst_7 = arith.constant 1.000000e-24 : f32
    %16 = vector.broadcast %cst_7 : f32 to vector<16x1xf32>
    %17 = arith.maximumf %15, %16 : vector<16x1xf32>
    %18 = math.rsqrt %17 : vector<16x1xf32>
    %19 = vector.broadcast %12 : vector<16x1xf32> to vector<16x32xf32>
    %20 = arith.mulf %3, %19 : vector<16x32xf32>
    %21 = vector.broadcast %18 : vector<16x1xf32> to vector<16x32xf32>
    %22 = arith.mulf %4, %21 : vector<16x32xf32>
    %cst_8 = arith.constant dense<0.000000e+00> : vector<16x16xf32>
    %23 = tpu.matmul %20, %22, %cst_8 {dimension_numbers = #tpu.dot_dimension_numbers<[1], [1], [0], [0], [0, 0, 1, 0], [], []>} : vector<16x32xf32>, vector<16x32xf32>, vector<16x16xf32> -> vector<16x16xf32>
    %c0_9 = arith.constant 0 : index
    %c0_10 = arith.constant 0 : index
    %24 = vector.load %arg5[%c0_9, %c0_10] : memref<16x1xf32, #tpu.memory_space<vmem>>, vector<16x1xf32>
    %cst_11 = arith.constant dense<0xFF800000> : vector<16xf32>
    %25 = vector.multi_reduction <maximumf>, %23, %cst_11 [1] : vector<16x16xf32> to vector<16xf32>
    %26 = vector.shape_cast %25 : vector<16xf32> to vector<16x1xf32>
    %27 = arith.maximumf %24, %26 : vector<16x1xf32>
    %c0_12 = arith.constant 0 : index
    %c0_13 = arith.constant 0 : index
    %28 = vector.load %arg6[%c0_12, %c0_13] : memref<16x1xf32, #tpu.memory_space<vmem>>, vector<16x1xf32>
    %29 = arith.subf %24, %27 : vector<16x1xf32>
    %30 = math.exp %29 : vector<16x1xf32>
    %31 = arith.mulf %28, %30 : vector<16x1xf32>
    %32 = vector.broadcast %27 : vector<16x1xf32> to vector<16x16xf32>
    %33 = arith.subf %23, %32 : vector<16x16xf32>
    %34 = math.exp %33 : vector<16x16xf32>
    %cst_14 = arith.constant dense<0.000000e+00> : vector<16xf32>
    %35 = vector.multi_reduction <add>, %34, %cst_14 [1] : vector<16x16xf32> to vector<16xf32>
    %36 = vector.shape_cast %35 : vector<16xf32> to vector<16x1xf32>
    %37 = arith.addf %31, %36 : vector<16x1xf32>
    %c0_15 = arith.constant 0 : index
    %c0_16 = arith.constant 0 : index
    %38 = vector.load %arg6[%c0_15, %c0_16] : memref<16x1xf32, #tpu.memory_space<vmem>>, vector<16x1xf32>
    tpu.vector_store %arg6[%c0_15, %c0_16], %37 {strides = array<i32>} : memref<16x1xf32, #tpu.memory_space<vmem>>, vector<16x1xf32>,
    %c0_17 = arith.constant 0 : index
    %c0_18 = arith.constant 0 : index
    %39 = vector.load %arg5[%c0_17, %c0_18] : memref<16x1xf32, #tpu.memory_space<vmem>>, vector<16x1xf32>
    tpu.vector_store %arg5[%c0_17, %c0_18], %27 {strides = array<i32>} : memref<16x1xf32, #tpu.memory_space<vmem>>, vector<16x1xf32>,
    %40 = arith.cmpi eq, %arg1, %arg0 : i32
    %41 = arith.extui %40 : i1 to i32
    %c0_i32_19 = arith.constant 0 : i32
    %42 = arith.cmpi ne, %41, %c0_i32_19 : i32
    scf.if %42 {
      %46 = arith.mulf %20, %22 : vector<16x32xf32>
      %cst_22 = arith.constant dense<0.000000e+00> : vector<16xf32>
      %47 = vector.multi_reduction <add>, %46, %cst_22 [1] : vector<16x32xf32> to vector<16xf32>
      %48 = vector.shape_cast %47 : vector<16xf32> to vector<16x1xf32>
      %c0_23 = arith.constant 0 : index
      %c0_24 = arith.constant 0 : index
      %49 = vector.load %arg7[%c0_23, %c0_24] : memref<16x1xf32, #tpu.memory_space<vmem>>, vector<16x1xf32>
      tpu.vector_store %arg7[%c0_23, %c0_24], %48 {strides = array<i32>} : memref<16x1xf32, #tpu.memory_space<vmem>>, vector<16x1xf32>,
    } else {
    }
    %c0_i32_20 = arith.constant 0 : i32
    %43 = arith.cmpi eq, %arg1, %c0_i32_20 : i32
    %44 = arith.extui %43 : i1 to i32
    %c0_i32_21 = arith.constant 0 : i32
    %45 = arith.cmpi ne, %44, %c0_i32_21 : i32
    scf.if %45 {
      %c0_22 = arith.constant 0 : index
      %c0_23 = arith.constant 0 : index
      %46 = vector.load %arg7[%c0_22, %c0_23] : memref<16x1xf32, #tpu.memory_space<vmem>>, vector<16x1xf32>
      %c0_24 = arith.constant 0 : index
      %c0_25 = arith.constant 0 : index
      %47 = vector.load %arg5[%c0_24, %c0_25] : memref<16x1xf32, #tpu.memory_space<vmem>>, vector<16x1xf32>
      %48 = arith.subf %46, %47 : vector<16x1xf32>
      %c0_26 = arith.constant 0 : index
      %c0_27 = arith.constant 0 : index
      %49 = vector.load %arg6[%c0_26, %c0_27] : memref<16x1xf32, #tpu.memory_space<vmem>>, vector<16x1xf32>
      %50 = math.log %49 : vector<16x1xf32>
      %51 = arith.subf %48, %50 : vector<16x1xf32>
      %cst_28 = arith.constant 0.000000e+00 : f32
      %52 = vector.broadcast %cst_28 : f32 to vector<16x1xf32>
      %53 = arith.subf %52, %51 : vector<16x1xf32>
      %c0_29 = arith.constant 0 : index
      %c0_30 = arith.constant 0 : index
      %54 = vector.load %arg4[%c0_29, %c0_30] : memref<16x1xf32, #tpu.memory_space<vmem>>, vector<16x1xf32>
      tpu.vector_store %arg4[%c0_29, %c0_30], %53 {strides = array<i32>} : memref<16x1xf32, #tpu.memory_space<vmem>>, vector<16x1xf32>,
    } else {
    }
    return
  }
  func.func @transform_0(%arg0: i32, %arg1: i32) -> (i32, i32) {
    %c0_i32 = arith.constant 0 : i32
    %c0_i32_0 = arith.constant 0 : i32
    return %arg0, %c0_i32 : i32, i32
  }
  func.func @transform_1(%arg0: i32, %arg1: i32) -> (i32, i32) {
    %c0_i32 = arith.constant 0 : i32
    %c0_i32_0 = arith.constant 0 : i32
    return %arg1, %c0_i32 : i32, i32
  }
  func.func @transform_2(%arg0: i32, %arg1: i32) -> (i32, i32) {
    %c0_i32 = arith.constant 0 : i32
    %c0_i32_0 = arith.constant 0 : i32
    return %arg0, %c0_i32 : i32, i32
  }
}

</mosaic_0001>

<bundles_post_ra>
// kernel: tpu_custom_call.1
= control target key start
LH: loop header
LB: loop body
LE: loop exit
PB: predicated region body
PF: predicated region fallthrough
CT: control target
= control target key end

     0   :  { %7 = vsyncpa [#allocation6], 0  ;;  %s441_s0 = inlined_call_operand.hbm [shape: f32[16,32], index: 0, kind: input, shape index: {}]   ;;  %s442_s1 = inlined_call_operand.hbm [shape: f32[16,32], index: 1, kind: input, shape index: {}]   ;;  %s443_s2 = inlined_call_operand.vmem [shape: f32[16,1], index: 2, kind: output, shape index: {}]  }
   0x1   :  { %8 = vsyncpa [#allocation8], 0  ;;  %s361_s9 = smov [#allocation5]   ;;  %s313_s13 = scalar_lea.hbm %s441_s0, 256 }
   0x2   :  { %s14_s10 = sshll.u32 %s361_s9, 4  ;;  %p314_p0 = scmp.ne.s32.totalorder %s441_s0, %s313_s13  ;;  %s15_s10 = int_to_ptr.vmem [resolvable:$true] %s14_s10 }
   0x3   :  { %p317_p1 = scmp.lt.u32.totalorder %s313_s13, %s441_s0 }
   0x5   :  { %p319_p2 = pnand %p317_p1, %p314_p0 }
   0x7   :  { %322 = shalt.err (!%p319_p2)
}
   0x8   :  { %s323_s18 = scalar_lea.vmem %s15_s10, 256  ;;  %p328_p4 = scmp.lt.s32.totalorder %s15_s10, %s15_s10 }
   0x9   :  { %p324_p3 = scmp.ne.s32.totalorder %s15_s10, %s323_s18  ;;  %p329_p5 = scmp.lt.s32.totalorder %s323_s18, %s323_s18 }
   0xb   :  { %p330_p6 = por %p329_p5, %p328_p4 }
   0xd   :  { %p331_p7 = pnand %p330_p6, %p324_p3 }
   0xf   :  { %334 = shalt.err (!%p331_p7)
}
  0x10   :  { %s362_s19 = smov 128   ;;  %s363_s20 = smov 8  }
  0x11   :  { %20 = dma.hbm_to_vmem [thread:$0]  %s441_s0, 256, %s15_s10, [#allocation6], %s362_s19, %s362_s19, %s363_s20  }
  0x12   :  { %s364_s23 = smov [#allocation7]   ;;  %s335_s27 = scalar_lea.hbm %s442_s1, 256 }
  0x13   :  { %s26_s24 = sshll.u32 %s364_s23, 4  ;;  %p336_p8 = scmp.ne.s32.totalorder %s442_s1, %s335_s27  ;;  %s27_s24 = int_to_ptr.vmem [resolvable:$true] %s26_s24 }
  0x14   :  { %p339_p9 = scmp.lt.u32.totalorder %s335_s27, %s442_s1 }
  0x16   :  { %p341_p10 = pnand %p339_p9, %p336_p8 }
  0x18   :  { %344 = shalt.err (!%p341_p10)
}
  0x19   :  { %s345_s4 = scalar_lea.vmem %s27_s24, 256  ;;  %p350_p12 = scmp.lt.s32.totalorder %s27_s24, %s27_s24 }
  0x1a   :  { %p346_p11 = scmp.ne.s32.totalorder %s27_s24, %s345_s4  ;;  %p351_p13 = scmp.lt.s32.totalorder %s345_s4, %s345_s4 }
  0x1c   :  { %p352_p0 = por %p351_p13, %p350_p12 }
  0x1e   :  { %p353_p1 = pnand %p352_p0, %p346_p11 }
  0x20   :  { %356 = shalt.err (!%p353_p1)
}
  0x21   :  { %32 = dma.hbm_to_vmem [thread:$0]  %s442_s1, 256, %s27_s24, [#allocation8], %s362_s19, %s362_s19, %s363_s20  }
  0x22   :  { %357 = dma.done.wait [#allocation6], 256  }
  0x23   :  { %358 = vsyncadd [#allocation6], 4294967040 }
  0x24   :  { %359 = dma.done.wait [#allocation8], 256  }
  0x25   :  { %360 = vsyncadd [#allocation8], 4294967040  ;;  %v52_v0 = vld [vmem:[#allocation7] sm:$0xff]  ;;  %vm56_vm0 = vcmask 261120   ;;  %v50_v1 = vld [vmem:[#allocation5] sm:$0xff]  ;;  %vm43_vm2 = vcmask 7168  }
  0x26   :  { %v53_v2 = vld [vmem:[#allocation7 + $0x8] sm:$0xff]  ;;  %v69_v3 = vmul.f32 %v52_v0, %v52_v0  ;;  %v54_v4 = vmul.f32 %v50_v1, %v50_v1  ;;  %v51_v6 = vld [vmem:[#allocation5 + $0x8] sm:$0xff]  ;;  %vm279_vm1 = vmpackc.low %vm56_vm0, %vm56_vm0  ;;  %v365_v33 = vmov -inf   ;;  %vm174_vm3 = vcmask 130048  }
  0x27   :  { %v70_v5 = vmul.f32 %v53_v2, %v53_v2  ;;  %v55_v7 = vmul.f32 %v51_v6, %v51_v6  ;;  %45 = vst.msk [vmem:[#allocation2 + $0x8] sm:$0xff] %vm43_vm2, %v365_v33  ;;  %44 = vst.msk [vmem:[#allocation2] sm:$0xff] %vm43_vm2, %v365_v33  ;;  %v366_v38 = vmov 0   ;;  %v367_v39 = vmov 0.0  }
  0x28   :  { %v71_v8 = vsel %vm56_vm0, %v69_v3, 0.0  ;;  %v57_v9 = vsel %vm56_vm0, %v54_v4, 0.0  ;;  %292 = vset.pattern.permute.xlu1 %v366_v38  ;;  %291 = vset.pattern.permute.xlu0 %v366_v38  ;;  %47 = vst.msk [vmem:[#allocation3 + $0x8] sm:$0xff] %vm43_vm2, %v367_v39  ;;  %46 = vst.msk [vmem:[#allocation3] sm:$0xff] %vm43_vm2, %v367_v39 }
  0x29   :  { %72 = vadd.xlane.f32.xlu0 %v71_v8  ;;  %58 = vadd.xlane.f32.xlu1 %v57_v9  ;;  %v74_v10 = vsel %vm56_vm0, %v70_v5, 0.0  ;;  %v60_v11 = vsel %vm56_vm0, %v55_v7, 0.0  ;;  %48 = vst.msk [vmem:[#allocation4] sm:$0xff] %vm43_vm2, %v367_v39  ;;  %49 = vst.msk [vmem:[#allocation4 + $0x8] sm:$0xff] %vm43_vm2, %v367_v39 }
  0x2d   :  { %75 = vadd.xlane.f32.xlu0 %v74_v10  ;;  %61 = vadd.xlane.f32.xlu1 %v60_v11 }
  0x2e   :  { %v173_v40 = vld [vmem:[#allocation2 + $0x8] sm:$0xff]  ;;  %v172_v41 = vld [vmem:[#allocation2] sm:$0xff] }
  0x2f   :  { %v184_v63 = vld [vmem:[#allocation3 + $0x8] sm:$0xff] }
  0xb6   :  { %v73_v12 = vpop.xlane.xlu0 %72  ;;  %v59_v13 = vpop.xlane.xlu1 %58 }
  0xb7   :  { %v77_v14 = vmax.f32 %v73_v12, 1e-24  ;;  %v63_v15 = vmax.f32 %v59_v13, 1e-24 }
  0xb9   :  { %293 = vrsqrt.f32 %v77_v14 }
  0xba   :  { %295 = vrsqrt.f32 %v63_v15  ;;  %v76_v16 = vpop.xlane.xlu0 %75  ;;  %v62_v17 = vpop.xlane.xlu1 %61 }
  0xbb   :  { %v78_v18 = vmax.f32 %v76_v16, 1e-24  ;;  %v64_v19 = vmax.f32 %v62_v17, 1e-24 }
  0xbd   :  { %297 = vrsqrt.f32 %v78_v18 }
  0xbe   :  { %299 = vrsqrt.f32 %v64_v19 }
  0xc3   :  { %v294_v20 = vpop.eup %293 }
  0xc4   :  { %v296_v21 = vpop.eup %295  ;;  %v83_v24 = vmul.f32 %v294_v20, %v52_v0 }
  0xc5   :  { %v67_v22 = vmul.f32 14.285714, %v296_v21 }
  0xc7   :  { %v298_v23 = vpop.eup %297  ;;  %v81_v25 = vmul.f32 %v67_v22, %v50_v1  ;;  %v183_v1 = vld [vmem:[#allocation3] sm:$0xff] }
  0xc8   :  { %v300_v26 = vpop.eup %299  ;;  %v84_v27 = vmul.f32 %v298_v23, %v53_v2 }
  0xc9   :  { %v68_v28 = vmul.f32 14.285714, %v300_v26  ;;  %275 = vmatprep.mubr.msk.f32.mxu0 %vm56_vm0, %v81_v25  ;;  %v226_v29 = vmul.f32 %v83_v24, %v81_v25 }
  0xca   :  { %v278_v30 = vpack.c.bf16 %v84_v27, %v83_v24 }
  0xcb   :  { %v82_v31 = vmul.f32 %v68_v28, %v51_v6  ;;  %v228_v58 = vsel %vm56_vm0, %v226_v29, 0.0 }
  0xcc   :  { %280 = vmatprep.subr.msk.bf16.mxu0 %vm279_vm1, %v278_v30 }
  0xcd   :  { %283 = vmatpush3.bf16.xpose.msk.msra.mxu0 %vm279_vm1, %v278_v30  ;;  %v227_v32 = vmul.f32 %v84_v27, %v82_v31 }
  0xcf   :  { %v231_v59 = vsel %vm56_vm0, %v227_v32, 0.0 }
  0xd4   :  { %276 = vmatmul.mubr.msk.f32.vlgmr.msra.gmra.mrb[0].mxu0 %vm56_vm0, %v82_v31 }
 0x1a7   :  { %v277_v34 = vpop.f32.mrb[0].mxu0 }
 0x1a8   :  { %v163_v35 = vpop.f32.mrb[1].mxu0  ;;  %v178_v36 = vsel %vm174_vm3, %v277_v34, -inf }
 0x1a9   :  { %179 = vmax.xlane.f32.xlu1 %v178_v36  ;;  %v175_v37 = vsel %vm174_vm3, %v163_v35, -inf }
 0x1aa   :  { %176 = vmax.xlane.f32.xlu0 %v175_v37 }
 0x236   :  { %v180_v42 = vpop.xlane.xlu1 %179 }
 0x237   :  { %v182_v43 = vmax.f32 %v173_v40, %v180_v42  ;;  %v177_v44 = vpop.xlane.xlu0 %176 }
 0x238   :  { %v181_v45 = vmax.f32 %v172_v41, %v177_v44 }
 0x239   :  { %v186_v46 = vsub.f32 %v173_v40, %v182_v43  ;;  %221 = vst.msk [vmem:[#allocation2 + $0x8] sm:$0xff] %vm43_vm2, %v182_v43  ;;  %200 = vperm.xlu1 %292, %v182_v43  }
 0x23a   :  { %v185_v47 = vsub.f32 %v172_v41, %v181_v45  ;;  %220 = vst.msk [vmem:[#allocation2] sm:$0xff] %vm43_vm2, %v181_v45  ;;  %195 = vperm.xlu0 %291, %v181_v45  }
 0x23b   :  { %v189_v60 = vmul.f32 1.442695, %v186_v46 }
 0x23c   :  { %v187_v61 = vmul.f32 1.442695, %v185_v47 }
 0x240   :  { %v242_v15 = vld [vmem:[#allocation2 + $0x8] sm:$0xff] }
 0x241   :  { %v241_v17 = vld [vmem:[#allocation2] sm:$0xff] }
 0x2b8   :  { %v201_v48 = vpop.permute.xlu1 %200 }
 0x2b9   :  { %v204_v49 = vsub.f32 %v277_v34, %v201_v48  ;;  %v196_v50 = vpop.permute.xlu0 %195 }
 0x2ba   :  { %v203_v51 = vsub.f32 %v163_v35, %v196_v50 }
 0x2bb   :  { %v207_v52 = vmul.f32 1.442695, %v204_v49 }
 0x2bc   :  { %v205_v53 = vmul.f32 1.442695, %v203_v51 }
 0x2bd   :  { %301 = vpow2.f32 %v207_v52 }
 0x2be   :  { %303 = vpow2.f32 %v205_v53 }
 0x2bf   :  { %305 = vpow2.f32 %v189_v60 }
 0x2c0   :  { %307 = vpow2.f32 %v187_v61 }
 0x2c7   :  { %v302_v54 = vpop.eup %301 }
 0x2c8   :  { %v304_v55 = vpop.eup %303  ;;  %v212_v56 = vsel %vm174_vm3, %v302_v54, 0.0 }
 0x2c9   :  { %213 = vadd.xlane.f32.xlu0 %v212_v56  ;;  %v209_v57 = vsel %vm174_vm3, %v304_v55, 0.0  ;;  %v306_v62 = vpop.eup %305 }
 0x2ca   :  { %210 = vadd.xlane.f32.xlu1 %v209_v57  ;;  %v308_v0 = vpop.eup %307  ;;  %v192_v2 = vmul.f32 %v306_v62, %v184_v63 }
 0x2cb   :  { %v191_v4 = vmul.f32 %v308_v0, %v183_v1 }
 0x2ce   :  { %229 = vadd.xlane.f32.xlu1 %v228_v58 }
 0x2d2   :  { %232 = vadd.xlane.f32.xlu1 %v231_v59 }
 0x356   :  { %v214_v3 = vpop.xlane.xlu0 %213 }
 0x357   :  { %v216_v5 = vadd.f32 %v214_v3, %v192_v2  ;;  %v211_v6 = vpop.xlane.xlu1 %210 }
 0x358   :  { %v215_v7 = vadd.f32 %v211_v6, %v191_v4 }
 0x359   :  { %219 = vst.msk [vmem:[#allocation3 + $0x8] sm:$0xff] %vm43_vm2, %v216_v5 }
 0x35a   :  { %218 = vst.msk [vmem:[#allocation3] sm:$0xff] %vm43_vm2, %v215_v7 }
 0x35b   :  { %v230_v8 = vpop.xlane.xlu1 %229 }
 0x35c   :  { %234 = vst.msk [vmem:[#allocation4] sm:$0xff] %vm43_vm2, %v230_v8 }
 0x35f   :  { %v233_v9 = vpop.xlane.xlu1 %232 }
 0x360   :  { %v246_v10 = vld [vmem:[#allocation3 + $0x8] sm:$0xff]  ;;  %235 = vst.msk [vmem:[#allocation4 + $0x8] sm:$0xff] %vm43_vm2, %v233_v9 }
 0x361   :  { %309 = vlog2.f32 %v246_v10  ;;  %v245_v11 = vld [vmem:[#allocation3] sm:$0xff] }
 0x362   :  { %311 = vlog2.f32 %v245_v11 }
 0x363   :  { %v239_v13 = vld [vmem:[#allocation4] sm:$0xff] }
 0x364   :  { %v243_v20 = vsub.f32 %v239_v13, %v241_v17 }
 0x367   :  { %v240_v12 = vld [vmem:[#allocation4 + $0x8] sm:$0xff] }
 0x368   :  { %v244_v18 = vsub.f32 %v240_v12, %v242_v15 }
 0x36b   :  { %v310_v14 = vpop.eup %309 }
 0x36c   :  { %v312_v16 = vpop.eup %311  ;;  %v250_v19 = vmul.f32 0.6931472, %v310_v14 }
 0x36d   :  { %v248_v21 = vmul.f32 0.6931472, %v312_v16 }
 0x36e   :  { %v252_v22 = vsub.f32 %v244_v18, %v250_v19 }
 0x36f   :  { %v251_v23 = vsub.f32 %v243_v20, %v248_v21 }
 0x370   :  { %v254_v24 = vsub.f32 0.0, %v252_v22 }
 0x371   :  { %v253_v25 = vsub.f32 0.0, %v251_v23 }
 0x372   :  { %256 = vst.msk [vmem:[%s443_s2 + $0x8] sm:$0xff] %vm43_vm2, %v254_v24 }
 0x373   :  { %255 = vst.msk [vmem:[%s443_s2] sm:$0xff] %vm43_vm2, %v253_v25 }
 0x374   :  { %261 = vsyncpa [#allocation6], 1 }
 0x375   :  { %262 = vsyncpa [#allocation8], 1 }

</bundles_post_ra>
